<compile_context>
chip_gen: v6e
topology: v6e:2x2x1
jax: 0.10.0
libtpu: 0.0.40
codegen_flags: <defaults>
</compile_context>

<pallas_src>
import functools
import math

import jax
import jax.numpy as jnp
import numpy as np
from jax.experimental import pallas as pl
from jax.experimental.pallas import tpu as pltpu

# ---- module configuration (KANLinear defaults) ------------------------------
IN_FEATURES = 16
OUT_FEATURES = 32
GRID_SIZE = 8
SPLINE_ORDER = 4
GRID_RANGE = (-1.0, 1.0)

GK = GRID_SIZE + SPLINE_ORDER                 # retained bases per feature (12)
N_KNOTS = GRID_SIZE + 2 * SPLINE_ORDER + 1    # knots per feature (17)
N_BASES0 = N_KNOTS - 1                        # degree-0 bases per feature (16)


def _round_up(v, m):
    return (v + m - 1) // m * m


# lane width of the flat basis layout (basis index major, feature minor)
FLAT_WIDTH = _round_up(N_BASES0 * IN_FEATURES, 128)      # 256
N_CONST_ROWS = 2 + 4 * SPLINE_ORDER                      # 18


# ---- kernel ------------------------------------------------------------------
def kan_linear_kernel(x_ref, rep_ref, consts_ref, wb_ref, ws_ref, o_ref):
    x = x_ref[...]                                        # (TB, IN) f32

    # Lane replication xr[b, j*IN + i] = x[b, i] via one MXU matmul against a
    # precomputed 0/1 matrix (replaces four concat relayout passes; MXU idle).
    xr = jnp.dot(x, rep_ref[...], preferred_element_type=jnp.float32)

    # Hoist all grid(knot)-derived constant rows once (loop below is unrolled).
    c = [consts_ref[r:r + 1, :] for r in range(N_CONST_ROWS)]

    # Degree-0 bases on half-open intervals [g_j, g_{j+1})  (matches PyTorch).
    bases = jnp.logical_and(xr >= c[0], xr < c[1]).astype(jnp.float32)

    # Divide-free Cox-de Boor recursion:
    #   bases <- (x*wl + bl)*bases + (br - x*wr)*shift_left(bases, IN)
    # The shift is an XLU lane rotate (np.roll semantics, shift = -IN mod 256);
    # wrapped lanes land where wr/br are zero, so the garbage is annihilated.
    for k in range(1, SPLINE_ORDER + 1):
        r = 2 + 4 * (k - 1)
        shifted = pltpu.roll(bases, shift=FLAT_WIDTH - IN_FEATURES, axis=1)
        bases = (xr * c[r] + c[r + 1]) * bases + (c[r + 3] - xr * c[r + 2]) * shifted

    # Two MXU matmuls summed (no lane-shifting concat / materialized act temp).
    # bases lanes >= GK*IN are exactly zero; w_spline rows there are zero too.
    silu_x = x * jax.nn.sigmoid(x)
    o_ref[...] = (
        jnp.dot(silu_x, wb_ref[...], preferred_element_type=jnp.float32)
        + jnp.dot(bases, ws_ref[...], preferred_element_type=jnp.float32)
    ).astype(o_ref.dtype)


# ---- one-time parameter preprocessing (hoisted out of the per-call path) -----
def prepare_kan_params(grid_if, base_weight, spline_weight, spline_scaler):
    """grid_if: (IN, N_KNOTS); base_weight: (OUT, IN);
       spline_weight: (OUT, IN, GK); spline_scaler: (OUT, IN).

    Returns:
      consts   : (18, FLAT_WIDTH) knot tables — rows 0/1: g_lo/g_hi for the
                 degree-0 indicator; rows 2+4(k-1)..: [wl, bl, wr, br] for
                 recursion step k (divides folded in; invalid lanes are zero).
      rep      : (IN, FLAT_WIDTH) 0/1 lane-replication matrix.
      w_base   : (IN, OUT) base_weight^T.
      w_spline : (FLAT_WIDTH, OUT) scaled spline weight in the flat basis
                 layout, zero-padded from GK*IN to FLAT_WIDTH rows.
    """
    g = grid_if.astype(jnp.float32)                       # (IN, N_KNOTS)

    def flat(a):                                          # (IN, n) -> (FLAT_WIDTH,)
        v = a.T.reshape(-1)                               # basis-major, feature-minor
        return jnp.pad(v, (0, FLAT_WIDTH - v.shape[0]))

    rows = [flat(g[:, :N_BASES0]), flat(g[:, 1:N_BASES0 + 1])]
    for k in range(1, SPLINE_ORDER + 1):
        nk = N_BASES0 - k
        g0 = g[:, 0:nk]                                   # g_j
        gk = g[:, k:k + nk]                               # g_{j+k}
        g1 = g[:, 1:1 + nk]                               # g_{j+1}
        gk1 = g[:, k + 1:k + 1 + nk]                      # g_{j+k+1}
        wl = 1.0 / (gk - g0)
        wr = 1.0 / (gk1 - g1)
        rows += [flat(wl), flat(-g0 * wl), flat(wr), flat(gk1 * wr)]
    consts = jnp.stack(rows, axis=0)                      # (18, FLAT_WIDTH)

    # 0/1 replication matrix: rep[i, j*IN + i] = 1  ->  x @ rep replicates x.
    rep = jnp.tile(jnp.eye(IN_FEATURES, dtype=jnp.float32), (1, N_BASES0))
    rep = jnp.pad(rep, ((0, 0), (0, FLAT_WIDTH - rep.shape[1])))

    w_base = base_weight.T.astype(jnp.float32)            # (IN, OUT)

    # scaled_spline_weight (enable_standalone_scale_spline=True)
    scaled = spline_weight * spline_scaler[:, :, None]    # (OUT, IN, GK)
    w_spline = jnp.transpose(scaled, (2, 1, 0)).reshape(GK * IN_FEATURES,
                                                        OUT_FEATURES)
    w_spline = jnp.pad(w_spline.astype(jnp.float32),
                       ((0, FLAT_WIDTH - GK * IN_FEATURES), (0, 0)))
    return consts, rep, w_base, w_spline


# ---- forward wrapper ---------------------------------------------------------
@functools.partial(jax.jit, static_argnames=("block_batch",))
def kan_linear_forward(x, consts, rep, w_base, w_spline, *, block_batch=1024):
    """x: (B, IN) f32. Other args from prepare_kan_params."""
    batch = x.shape[0]
    padded0 = _round_up(max(batch, 1), 8)
    tb = _round_up(min(block_batch, padded0), 8)
    # Guarantee >=2 grid steps whenever the batch allows it so the "parallel"
    # batch axis can shard across v7x's two TensorCores (no-op on v5e/v6e).
    if padded0 // tb < 2 and padded0 > 8:
        tb = _round_up(pl.cdiv(padded0, 2), 8)
    padded = _round_up(batch, tb)
    if padded != batch:
        x = jnp.pad(x, ((0, padded - batch), (0, 0)))

    out = pl.pallas_call(
        kan_linear_kernel,
        out_shape=jax.ShapeDtypeStruct((padded, OUT_FEATURES), x.dtype),
        grid_spec=pltpu.PrefetchScalarGridSpec(
            num_scalar_prefetch=0,
            grid=(padded // tb,),
            in_specs=[
                pl.BlockSpec((tb, IN_FEATURES), lambda b: (b, 0)),
                # Constant-index blocks: single-buffered, stay resident.
                pl.BlockSpec((IN_FEATURES, FLAT_WIDTH), lambda b: (0, 0),
                             pipeline_mode=pl.Buffered(1)),
                pl.BlockSpec((N_CONST_ROWS, FLAT_WIDTH), lambda b: (0, 0),
                             pipeline_mode=pl.Buffered(1)),
                pl.BlockSpec((IN_FEATURES, OUT_FEATURES), lambda b: (0, 0),
                             pipeline_mode=pl.Buffered(1)),
                pl.BlockSpec((FLAT_WIDTH, OUT_FEATURES), lambda b: (0, 0),
                             pipeline_mode=pl.Buffered(1)),
            ],
            out_specs=pl.BlockSpec((tb, OUT_FEATURES), lambda b: (b, 0)),
        ),
        compiler_params=pltpu.CompilerParams(
            dimension_semantics=("parallel",),
            # Explicit scoped-VMEM budget: tb=1024 uses ~6-7 MiB of whole-tile
            # temporaries, tb=2048 ~13 MiB; 32 MiB is safe on v5e/v6e/v7x.
            vmem_limit_bytes=32 * 1024 * 1024),
    )(x, rep, consts, w_base, w_spline)
    return out[:batch]


# ---- pure-JAX reference (mirrors the PyTorch forward exactly) ----------------
def reference_forward(x, grid_if, base_weight, spline_weight, spline_scaler):
    xe = x[:, :, None]                                    # (B, IN, 1)
    g = grid_if[None, :, :]                               # (1, IN, N_KNOTS)
    bases = jnp.logical_and(xe >= g[:, :, :-1],
                            xe < g[:, :, 1:]).astype(x.dtype)
    for k in range(1, SPLINE_ORDER + 1):
        left = ((xe - g[:, :, : -(k + 1)])
                / (g[:, :, k:-1] - g[:, :, : -(k + 1)])) * bases[:, :, :-1]
        right = ((g[:, :, k + 1:] - xe)
                 / (g[:, :, k + 1:] - g[:, :, 1:-k])) * bases[:, :, 1:]
        bases = left + right
    bases = bases[:, :, :GK]                              # (B, IN, GK)
    base_out = (x * jax.nn.sigmoid(x)) @ base_weight.T    # (B, OUT)
    scaled = spline_weight * spline_scaler[:, :, None]    # (OUT, IN, GK)
    spline_out = bases.reshape(x.shape[0], -1) @ scaled.reshape(OUT_FEATURES, -1).T
    return base_out + spline_out


if __name__ == "__main__":
    BATCH = 50
    key = jax.random.PRNGKey(0)
    k_x, k_bw, k_sw, k_sc = jax.random.split(key, 4)

    # knot grid (deterministic, same as the PyTorch __init__)
    h = (GRID_RANGE[1] - GRID_RANGE[0]) / GRID_SIZE
    knots = (jnp.arange(-SPLINE_ORDER, GRID_SIZE + SPLINE_ORDER + 1,
                        dtype=jnp.float32) * h + GRID_RANGE[0])
    grid_if = jnp.broadcast_to(knots, (IN_FEATURES, N_KNOTS))   # (IN, N_KNOTS)

    # deterministic synthetic parameters (shapes from __init__)
    bound = 1.0 / math.sqrt(IN_FEATURES)
    base_weight = jax.random.uniform(
        k_bw, (OUT_FEATURES, IN_FEATURES), jnp.float32, -bound, bound)
    spline_weight = 0.1 * jax.random.normal(
        k_sw, (OUT_FEATURES, IN_FEATURES, GK), jnp.float32)
    spline_scaler = jax.random.uniform(
        k_sc, (OUT_FEATURES, IN_FEATURES), jnp.float32, -bound, bound)

    # example input
    x = 0.5 * jax.random.normal(k_x, (BATCH, IN_FEATURES), jnp.float32)

    # one-time parameter preprocessing (outside the per-call hot path)
    consts, rep, w_base, w_spline = prepare_kan_params(
        grid_if, base_weight, spline_weight, spline_scaler)

    ref = reference_forward(x, grid_if, base_weight, spline_weight, spline_scaler)

    # Production path: default block_batch; the >=2-step guard splits the
    # batch so the "parallel" grid axis can use both v7x TensorCores.
    out = kan_linear_forward(x, consts, rep, w_base, w_spline)
    out = jax.block_until_ready(out)
    np.testing.assert_allclose(np.asarray(out), np.asarray(ref),
                               rtol=1e-4, atol=1e-4)

    # Multi-step path with batch padding (small tile to exercise the pipeline).
    out2 = kan_linear_forward(x, consts, rep, w_base, w_spline, block_batch=16)
    out2 = jax.block_until_ready(out2)
    np.testing.assert_allclose(np.asarray(out2), np.asarray(ref),
                               rtol=1e-4, atol=1e-4)

    print("KERNEL_OK")
</pallas_src>

<mosaic_0001>
module attributes {stable_mosaic.version = 11 : i64} {
  func.func @kan_linear_kernel(%arg0: i32, %arg1: memref<32x16xf32, #tpu.memory_space<vmem>>, %arg2: memref<16x256xf32, #tpu.memory_space<vmem>>, %arg3: memref<18x256xf32, #tpu.memory_space<vmem>>, %arg4: memref<16x32xf32, #tpu.memory_space<vmem>>, %arg5: memref<256x32xf32, #tpu.memory_space<vmem>>, %arg6: memref<32x32xf32, #tpu.memory_space<vmem>>) attributes {dimension_semantics = [#tpu.dimension_semantics<parallel>], iteration_bounds = array<i64: 2>, scalar_prefetch = 0 : i64, scratch_operands = 0 : i64, tpu.core_type = #tpu.core_type<tc>, window_params = [{transform_indices = @transform_0, window_bounds = array<i64: 32, 16>}, {pipeline_mode = #tpu.pipeline_mode<synchronous>, transform_indices = @transform_1, window_bounds = array<i64: 16, 256>}, {pipeline_mode = #tpu.pipeline_mode<synchronous>, transform_indices = @transform_2, window_bounds = array<i64: 18, 256>}, {pipeline_mode = #tpu.pipeline_mode<synchronous>, transform_indices = @transform_3, window_bounds = array<i64: 16, 32>}, {pipeline_mode = #tpu.pipeline_mode<synchronous>, transform_indices = @transform_4, window_bounds = array<i64: 256, 32>}, {transform_indices = @transform_5, window_bounds = array<i64: 32, 32>}]} {
    %c0 = arith.constant 0 : index
    %c0_0 = arith.constant 0 : index
    %0 = vector.load %arg1[%c0, %c0_0] : memref<32x16xf32, #tpu.memory_space<vmem>>, vector<32x16xf32>
    %c0_1 = arith.constant 0 : index
    %c0_2 = arith.constant 0 : index
    %1 = vector.load %arg2[%c0_1, %c0_2] : memref<16x256xf32, #tpu.memory_space<vmem>>, vector<16x256xf32>
    %cst = arith.constant dense<0.000000e+00> : vector<32x256xf32>
    %2 = tpu.matmul %0, %1, %cst {dimension_numbers = #tpu.dot_dimension_numbers<[1], [0], [0], [1], [0, 0, 1, 1], [], []>} : vector<32x16xf32>, vector<16x256xf32>, vector<32x256xf32> -> vector<32x256xf32>
    %c0_3 = arith.constant 0 : index
    %c0_4 = arith.constant 0 : index
    %3 = vector.load %arg3[%c0_3, %c0_4] : memref<18x256xf32, #tpu.memory_space<vmem>>, vector<1x256xf32>
    %c1 = arith.constant 1 : index
    %c0_5 = arith.constant 0 : index
    %4 = vector.load %arg3[%c1, %c0_5] : memref<18x256xf32, #tpu.memory_space<vmem>>, vector<1x256xf32>
    %c2 = arith.constant 2 : index
    %c0_6 = arith.constant 0 : index
    %5 = vector.load %arg3[%c2, %c0_6] : memref<18x256xf32, #tpu.memory_space<vmem>>, vector<1x256xf32>
    %c3 = arith.constant 3 : index
    %c0_7 = arith.constant 0 : index
    %6 = vector.load %arg3[%c3, %c0_7] : memref<18x256xf32, #tpu.memory_space<vmem>>, vector<1x256xf32>
    %c4 = arith.constant 4 : index
    %c0_8 = arith.constant 0 : index
    %7 = vector.load %arg3[%c4, %c0_8] : memref<18x256xf32, #tpu.memory_space<vmem>>, vector<1x256xf32>
    %c5 = arith.constant 5 : index
    %c0_9 = arith.constant 0 : index
    %8 = vector.load %arg3[%c5, %c0_9] : memref<18x256xf32, #tpu.memory_space<vmem>>, vector<1x256xf32>
    %c6 = arith.constant 6 : index
    %c0_10 = arith.constant 0 : index
    %9 = vector.load %arg3[%c6, %c0_10] : memref<18x256xf32, #tpu.memory_space<vmem>>, vector<1x256xf32>
    %c7 = arith.constant 7 : index
    %c0_11 = arith.constant 0 : index
    %10 = vector.load %arg3[%c7, %c0_11] : memref<18x256xf32, #tpu.memory_space<vmem>>, vector<1x256xf32>
    %c8 = arith.constant 8 : index
    %c0_12 = arith.constant 0 : index
    %11 = vector.load %arg3[%c8, %c0_12] : memref<18x256xf32, #tpu.memory_space<vmem>>, vector<1x256xf32>
    %c9 = arith.constant 9 : index
    %c0_13 = arith.constant 0 : index
    %12 = vector.load %arg3[%c9, %c0_13] : memref<18x256xf32, #tpu.memory_space<vmem>>, vector<1x256xf32>
    %c10 = arith.constant 10 : index
    %c0_14 = arith.constant 0 : index
    %13 = vector.load %arg3[%c10, %c0_14] : memref<18x256xf32, #tpu.memory_space<vmem>>, vector<1x256xf32>
    %c11 = arith.constant 11 : index
    %c0_15 = arith.constant 0 : index
    %14 = vector.load %arg3[%c11, %c0_15] : memref<18x256xf32, #tpu.memory_space<vmem>>, vector<1x256xf32>
    %c12 = arith.constant 12 : index
    %c0_16 = arith.constant 0 : index
    %15 = vector.load %arg3[%c12, %c0_16] : memref<18x256xf32, #tpu.memory_space<vmem>>, vector<1x256xf32>
    %c13 = arith.constant 13 : index
    %c0_17 = arith.constant 0 : index
    %16 = vector.load %arg3[%c13, %c0_17] : memref<18x256xf32, #tpu.memory_space<vmem>>, vector<1x256xf32>
    %c14 = arith.constant 14 : index
    %c0_18 = arith.constant 0 : index
    %17 = vector.load %arg3[%c14, %c0_18] : memref<18x256xf32, #tpu.memory_space<vmem>>, vector<1x256xf32>
    %c15 = arith.constant 15 : index
    %c0_19 = arith.constant 0 : index
    %18 = vector.load %arg3[%c15, %c0_19] : memref<18x256xf32, #tpu.memory_space<vmem>>, vector<1x256xf32>
    %c16 = arith.constant 16 : index
    %c0_20 = arith.constant 0 : index
    %19 = vector.load %arg3[%c16, %c0_20] : memref<18x256xf32, #tpu.memory_space<vmem>>, vector<1x256xf32>
    %c17 = arith.constant 17 : index
    %c0_21 = arith.constant 0 : index
    %20 = vector.load %arg3[%c17, %c0_21] : memref<18x256xf32, #tpu.memory_space<vmem>>, vector<1x256xf32>
    %21 = vector.broadcast %3 : vector<1x256xf32> to vector<32x256xf32>
    %22 = arith.cmpf oge, %2, %21 : vector<32x256xf32>
    %23 = vector.broadcast %4 : vector<1x256xf32> to vector<32x256xf32>
    %24 = arith.cmpf olt, %2, %23 : vector<32x256xf32>
    %25 = arith.andi %22, %24 : vector<32x256xi1>
    %26 = arith.extui %25 : vector<32x256xi1> to vector<32x256xi32>
    %27 = arith.sitofp %26 : vector<32x256xi32> to vector<32x256xf32>
    %c240_i32 = arith.constant 240 : i32
    %28 = tpu.dynamic_rotate %27 by %c240_i32 dim 1 : vector<32x256xf32>, i32 -> vector<32x256xf32>
    %29 = vector.broadcast %5 : vector<1x256xf32> to vector<32x256xf32>
    %30 = arith.mulf %2, %29 : vector<32x256xf32>
    %31 = vector.broadcast %6 : vector<1x256xf32> to vector<32x256xf32>
    %32 = arith.addf %30, %31 : vector<32x256xf32>
    %33 = arith.mulf %32, %27 : vector<32x256xf32>
    %34 = vector.broadcast %7 : vector<1x256xf32> to vector<32x256xf32>
    %35 = arith.mulf %2, %34 : vector<32x256xf32>
    %36 = vector.broadcast %8 : vector<1x256xf32> to vector<32x256xf32>
    %37 = arith.subf %36, %35 : vector<32x256xf32>
    %38 = arith.mulf %37, %28 : vector<32x256xf32>
    %39 = arith.addf %33, %38 : vector<32x256xf32>
    %c240_i32_22 = arith.constant 240 : i32
    %40 = tpu.dynamic_rotate %39 by %c240_i32_22 dim 1 : vector<32x256xf32>, i32 -> vector<32x256xf32>
    %41 = vector.broadcast %9 : vector<1x256xf32> to vector<32x256xf32>
    %42 = arith.mulf %2, %41 : vector<32x256xf32>
    %43 = vector.broadcast %10 : vector<1x256xf32> to vector<32x256xf32>
    %44 = arith.addf %42, %43 : vector<32x256xf32>
    %45 = arith.mulf %44, %39 : vector<32x256xf32>
    %46 = vector.broadcast %11 : vector<1x256xf32> to vector<32x256xf32>
    %47 = arith.mulf %2, %46 : vector<32x256xf32>
    %48 = vector.broadcast %12 : vector<1x256xf32> to vector<32x256xf32>
    %49 = arith.subf %48, %47 : vector<32x256xf32>
    %50 = arith.mulf %49, %40 : vector<32x256xf32>
    %51 = arith.addf %45, %50 : vector<32x256xf32>
    %c240_i32_23 = arith.constant 240 : i32
    %52 = tpu.dynamic_rotate %51 by %c240_i32_23 dim 1 : vector<32x256xf32>, i32 -> vector<32x256xf32>
    %53 = vector.broadcast %13 : vector<1x256xf32> to vector<32x256xf32>
    %54 = arith.mulf %2, %53 : vector<32x256xf32>
    %55 = vector.broadcast %14 : vector<1x256xf32> to vector<32x256xf32>
    %56 = arith.addf %54, %55 : vector<32x256xf32>
    %57 = arith.mulf %56, %51 : vector<32x256xf32>
    %58 = vector.broadcast %15 : vector<1x256xf32> to vector<32x256xf32>
    %59 = arith.mulf %2, %58 : vector<32x256xf32>
    %60 = vector.broadcast %16 : vector<1x256xf32> to vector<32x256xf32>
    %61 = arith.subf %60, %59 : vector<32x256xf32>
    %62 = arith.mulf %61, %52 : vector<32x256xf32>
    %63 = arith.addf %57, %62 : vector<32x256xf32>
    %c240_i32_24 = arith.constant 240 : i32
    %64 = tpu.dynamic_rotate %63 by %c240_i32_24 dim 1 : vector<32x256xf32>, i32 -> vector<32x256xf32>
    %65 = vector.broadcast %17 : vector<1x256xf32> to vector<32x256xf32>
    %66 = arith.mulf %2, %65 : vector<32x256xf32>
    %67 = vector.broadcast %18 : vector<1x256xf32> to vector<32x256xf32>
    %68 = arith.addf %66, %67 : vector<32x256xf32>
    %69 = arith.mulf %68, %63 : vector<32x256xf32>
    %70 = vector.broadcast %19 : vector<1x256xf32> to vector<32x256xf32>
    %71 = arith.mulf %2, %70 : vector<32x256xf32>
    %72 = vector.broadcast %20 : vector<1x256xf32> to vector<32x256xf32>
    %73 = arith.subf %72, %71 : vector<32x256xf32>
    %74 = arith.mulf %73, %64 : vector<32x256xf32>
    %75 = arith.addf %69, %74 : vector<32x256xf32>
    %76 = arith.negf %0 : vector<32x16xf32>
    %77 = math.exp %76 : vector<32x16xf32>
    %cst_25 = arith.constant 1.000000e+00 : f32
    %78 = vector.broadcast %cst_25 : f32 to vector<32x16xf32>
    %79 = arith.addf %78, %77 : vector<32x16xf32>
    %80 = arith.divf %78, %79 : vector<32x16xf32>
    %81 = arith.mulf %0, %80 : vector<32x16xf32>
    %c0_26 = arith.constant 0 : index
    %c0_27 = arith.constant 0 : index
    %82 = vector.load %arg4[%c0_26, %c0_27] : memref<16x32xf32, #tpu.memory_space<vmem>>, vector<16x32xf32>
    %cst_28 = arith.constant dense<0.000000e+00> : vector<32x32xf32>
    %83 = tpu.matmul %81, %82, %cst_28 {dimension_numbers = #tpu.dot_dimension_numbers<[1], [0], [0], [1], [0, 0, 1, 1], [], []>} : vector<32x16xf32>, vector<16x32xf32>, vector<32x32xf32> -> vector<32x32xf32>
    %c0_29 = arith.constant 0 : index
    %c0_30 = arith.constant 0 : index
    %84 = vector.load %arg5[%c0_29, %c0_30] : memref<256x32xf32, #tpu.memory_space<vmem>>, vector<256x32xf32>
    %cst_31 = arith.constant dense<0.000000e+00> : vector<32x32xf32>
    %85 = tpu.matmul %75, %84, %cst_31 {dimension_numbers = #tpu.dot_dimension_numbers<[1], [0], [0], [1], [0, 0, 1, 1], [], []>} : vector<32x256xf32>, vector<256x32xf32>, vector<32x32xf32> -> vector<32x32xf32>
    %86 = arith.addf %83, %85 : vector<32x32xf32>
    %c0_32 = arith.constant 0 : index
    %c0_33 = arith.constant 0 : index
    %87 = vector.load %arg6[%c0_32, %c0_33] : memref<32x32xf32, #tpu.memory_space<vmem>>, vector<32x32xf32>
    tpu.vector_store %arg6[%c0_32, %c0_33], %86 {strides = array<i32>} : memref<32x32xf32, #tpu.memory_space<vmem>>, vector<32x32xf32>,
    return
  }
  func.func @transform_0(%arg0: i32) -> (i32, i32) {
    %c0_i32 = arith.constant 0 : i32
    %c0_i32_0 = arith.constant 0 : i32
    return %arg0, %c0_i32 : i32, i32
  }
  func.func @transform_1(%arg0: i32) -> (i32, i32) {
    %c0_i32 = arith.constant 0 : i32
    %c0_i32_0 = arith.constant 0 : i32
    %c0_i32_1 = arith.constant 0 : i32
    return %c0_i32, %c0_i32_0 : i32, i32
  }
  func.func @transform_2(%arg0: i32) -> (i32, i32) {
    %c0_i32 = arith.constant 0 : i32
    %c0_i32_0 = arith.constant 0 : i32
    %c0_i32_1 = arith.constant 0 : i32
    return %c0_i32, %c0_i32_0 : i32, i32
  }
  func.func @transform_3(%arg0: i32) -> (i32, i32) {
    %c0_i32 = arith.constant 0 : i32
    %c0_i32_0 = arith.constant 0 : i32
    %c0_i32_1 = arith.constant 0 : i32
    return %c0_i32, %c0_i32_0 : i32, i32
  }
  func.func @transform_4(%arg0: i32) -> (i32, i32) {
    %c0_i32 = arith.constant 0 : i32
    %c0_i32_0 = arith.constant 0 : i32
    %c0_i32_1 = arith.constant 0 : i32
    return %c0_i32, %c0_i32_0 : i32, i32
  }
  func.func @transform_5(%arg0: i32) -> (i32, i32) {
    %c0_i32 = arith.constant 0 : i32
    %c0_i32_0 = arith.constant 0 : i32
    return %arg0, %c0_i32 : i32, i32
  }
}

</mosaic_0001>

<bundles_post_ra>
// kernel: kan_linear_forward.1
= control target key start
LH: loop header
LB: loop body
LE: loop exit
PB: predicated region body
PF: predicated region fallthrough
CT: control target
= control target key end

     0   :  { %s1433_s18 = smov 0   ;;  %s2402_s0 = inlined_call_operand.vmem [shape: f32[64,16], index: 0, kind: input, shape index: {}]   ;;  %s2403_s1 = inlined_call_operand.vmem [shape: f32[16,256], index: 1, kind: input, shape index: {}]   ;;  %s2404_s2 = inlined_call_operand.vmem [shape: f32[18,256], index: 2, kind: input, shape index: {}]   ;;  %s2405_s3 = inlined_call_operand.vmem [shape: f32[16,32], index: 3, kind: input, shape index: {}]   ;;  %s2406_s4 = inlined_call_operand.vmem [shape: f32[256,32], index: 4, kind: input, shape index: {}]   ;;  %s2407_s5 = inlined_call_operand.vmem [shape: f32[64,32], index: 5, kind: output, shape index: {}]  }
   0x1 LB: > { %s1239_s19 = sadd.s32 4294967295, %s1399_s18   ;;  %p1243_p0 = scmp.ge.s32.totalorder %s1399_s18, 1  ;;  %s1399_s18 = sphi %s1433_s18, %s15_s18  }
   0x2   : > { %p188_p1 = scmp.lt.s32.totalorder %s1399_s18, 3 }
   0x4   : > { %p189_p2 = pnand %p1243_p0, %p188_p1 }
   0x6   : > { %192 = sbr.rel (%p189_p2) target bundleno = 914 (0x392), region = 40 }
   0xb   : > { %v235_v0 = vld [vmem:[%s2403_s1 + $0x18] sm:$0xff]  ;;  %v234_v1 = vld [vmem:[%s2403_s1 + $0x10] sm:$0xff]  ;;  %v233_v2 = vld [vmem:[%s2403_s1 + $0x8] sm:$0xff]  ;;  %s1244_s26 = sshll.u32 %s1239_s19, 2  ;;  %v1401_v4 = vmov 0.0   ;;  %vm236_vm0 = vcmask 130048   ;;  %v2408_v14 = vlaneseq }
   0xc   : > { %277 = vmatprep.subr.mxu0 %v235_v0  ;;  %v232_v3 = vld [vmem:[%s2403_s1] sm:$0xff]  ;;  %313 = vmatprep.mubr.f32.mxu0 %v1401_v4  ;;  %p217_p3 = scmp.lt.s32.totalorder %s1244_s26, 7  ;;  %v1259_v24 = vld [vmem:[%s2404_s2 + $0x10] ss:$8 sm:$0x3]  ;;  %s1402_s16 = smov 112  }
   0xd   : > { %278 = vmatpush1.msra.mxu0 %v234_v1  ;;  %v375_v15 = vshrl.u32 %v2408_v14, 7  ;;  %v338_v17 = vld [vmem:[%s2404_s2] ss:$8 sm:$0x3] }
   0xe   : > { %279 = vmatprep.subr.mxu0 %v233_v2  ;;  %s2533_s26 = smov (!%p217_p3, %s1244_s26), 7  ;;  %v1252_v18 = vld [vmem:[%s2404_s2 + $0x1] ss:$8 sm:$0x3] }
   0xf   : > { %280 = vmatpush1.msra.mxu0 %v232_v3  ;;  %s1245_s29 = sshll.u32 %s2533_s26, 3  ;;  %v1480_v16 = vsub.s32 0, %v375_v15  ;;  %v1253_v19 = vld [vmem:[%s2404_s2 + $0x2] ss:$8 sm:$0x3]  ;;  %v1491_v20 = vsub.s32 1, %v375_v15 }
  0x10   : > { %s220_s7 = scalar_lea.vmem %s2402_s0, %s1245_s29  ;;  %v1254_v21 = vld [vmem:[%s2404_s2 + $0x3] ss:$8 sm:$0x3]  ;;  %v1255_v22 = vld [vmem:[%s2404_s2 + $0x4] ss:$8 sm:$0x3] }
  0x11   : > { %v228_v5 = vld [vmem:[%s220_s7] sm:$0xff]  ;;  %v1464_v7 = vld [vmem:[%s220_s7 + $0x8] sm:$0xff]  ;;  %v1469_v8 = vld [vmem:[%s220_s7 + $0x10] sm:$0xff]  ;;  %v1506_v25 = vrot.slane %v338_v17, %v1480_v16  ;;  %v1509_v26 = vrot.slane %v1252_v18, %v1480_v16  ;;  %v1518_v29 = vrot.slane %v338_v17, %v1491_v20  ;;  %v1521_v30 = vrot.slane %v1252_v18, %v1491_v20 }
  0x12   : > { %1248 = vmatmul.mubr.msk.f32.vlgmr.msra.gmra.mxu0 %vm236_vm0, %v228_v5  ;;  %v1277_v6 = vmul.f32 -1.442695, %v228_v5  ;;  %2443 = vst [vmem:[#allocation2_spill] sm:$0xff] %v1464_v7  ;;  %2444 = vst [vmem:[#allocation3_spill] sm:$0xff] %v1469_v8  ;;  %v1474_v9 = vld [vmem:[%s220_s7 + $0x18] sm:$0xff]  ;;  %v1524_v31 = vrot.slane %v1253_v19, %v1480_v16  ;;  %v1527_v32 = vrot.slane %v1253_v19, %v1491_v20  ;;  %s226_s7 = scalar_lea.vmem %s2407_s5, %s1245_s29 }
  0x13   : > { %319 = vmatprep.mubr.f32.mxu0 %v1401_v4  ;;  %2445 = vst [vmem:[#allocation4_spill] sm:$0xff] %v1474_v9  ;;  %v1256_v23 = vld [vmem:[%s2404_s2 + $0x5] ss:$8 sm:$0x3]  ;;  %v1538_v35 = vrot.slane %v1254_v21, %v1480_v16  ;;  %v1541_v36 = vrot.slane %v1255_v22, %v1480_v16  ;;  %v1547_v38 = vrot.slane %v1255_v22, %v1491_v20 }
  0x14   : > { %1377 = vpow2.f32 %v1277_v6  ;;  %v1260_v27 = vld [vmem:[%s2404_s2 + $0x11] ss:$8 sm:$0x3]  ;;  %v1257_v28 = vld [vmem:[%s2404_s2 + $0x6] ss:$8 sm:$0x3]  ;;  %v1544_v37 = vrot.slane %v1256_v23, %v1480_v16  ;;  %v1558_v41 = vrot.slane %v1254_v21, %v1491_v20  ;;  %v1561_v42 = vrot.slane %v1256_v23, %v1491_v20 }
  0x15   : > { %v1263_v33 = vld [vmem:[%s2404_s2 + $0x14] ss:$8 sm:$0x3]  ;;  %v1535_v34 = vld [vmem:[%s2404_s2 + $0x12] ss:$8 sm:$0x3]  ;;  %v1564_v43 = vrot.slane %v1259_v24, %v1480_v16  ;;  %v1567_v44 = vrot.slane %v1259_v24, %v1491_v20  ;;  %v1580_v47 = vrot.slane %v1260_v27, %v1480_v16  ;;  %v1583_v48 = vrot.slane %v1257_v28, %v1480_v16 }
  0x16   : > { %1249 = vmatmul.mubr.msk.f32.gmra.mxu0 %vm236_vm0, %v1464_v7  ;;  %v1258_v39 = vld [vmem:[%s2404_s2 + $0x7] ss:$8 sm:$0x3]  ;;  %v1555_v40 = vld [vmem:[%s2404_s2 + $0x15] ss:$8 sm:$0x3]  ;;  %v1586_v49 = vrot.slane %v1263_v33, %v1480_v16  ;;  %v1590_v50 = vrot.slane %v1535_v34, %v1480_v16  ;;  %v1593_v51 = vrot.slane %v1260_v27, %v1491_v20  ;;  %v1599_v53 = vrot.slane %v1257_v28, %v1491_v20 }
  0x17   : > { %325 = vmatprep.mubr.f32.mxu0 %v1401_v4  ;;  %2446 = vst [vmem:[#allocation5_spill] sm:$0xff] %v1567_v44  ;;  %v1572_v45 = vld [vmem:[%s2404_s2 + $0x13] ss:$8 sm:$0x3]  ;;  %v1596_v52 = vrot.slane %v1258_v39, %v1480_v16  ;;  %v1602_v54 = vrot.slane %v1263_v33, %v1491_v20  ;;  %v1607_v56 = vrot.slane %v1258_v39, %v1491_v20 }
  0x18   : > { %v1577_v46 = vld [vmem:[%s2404_s2 + $0x20] ss:$8 sm:$0x3]  ;;  %2447 = vst [vmem:[#allocation6_spill] sm:$0xff] %v1593_v51  ;;  %v1611_v57 = vrot.slane %v1555_v40, %v1480_v16  ;;  %v1615_v58 = vrot.slane %v1572_v45, %v1480_v16 }
  0x19   : > { %2448 = vst [vmem:[#allocation7_spill] sm:$0xff] %v1602_v54  ;;  %v1619_v59 = vrot.slane %v1577_v46, %v1480_v16 }
  0x1a   : > { %1250 = vmatmul.mubr.msk.f32.gmra.mxu0 %vm236_vm0, %v1469_v8  ;;  %2449 = vst [vmem:[#allocation8_spill] sm:$0xff] %v1611_v57 }
  0x1b   : > { %331 = vmatprep.mubr.f32.mxu0 %v1401_v4 }
  0x1e   : > { %1251 = vmatmul.mubr.msk.f32.gmra.mxu0 %vm236_vm0, %v1474_v9 }
  0x21   : > { %v1378_v10 = vpop.eup %1377 }
  0x22   : > { %v946_v11 = vadd.f32 1.0, %v1378_v10 }
  0x24   : > { %1379 = vrcp.f32 %v946_v11 }
  0x31   : > { %v1380_v12 = vpop.eup %1379 }
  0x32   : > { %v958_v13 = vmul.f32 %v1380_v12, %v228_v5 }
  0x34   : > { %1341 = vmatprep.mubr.msk.f32.mxu0 %vm236_vm0, %v958_v13 }
  0xd2   : > { %v1604_v55 = vpop.f32.mrf.mxu0 }
  0xd3   : > { %vm384_vm1 = vcmp.ge.f32.partialorder %v1604_v55, %v1506_v25  ;;  %vm403_vm2 = vcmp.lt.f32.partialorder %v1604_v55, %v1509_v26  ;;  %v473_v60 = vmul.f32 %v1524_v31, %v1604_v55  ;;  %v1629_v61 = vmul.f32 %v1541_v36, %v1604_v55 }
  0xd4   : > { %v1631_v62 = vpop.f32.mrf.mxu0  ;;  %vm411_vm3 = vmand %vm384_vm1, %vm403_vm2  ;;  %v1635_v63 = vmul.f32 %v1564_v43, %v1604_v55  ;;  %v1639_v0 = vmul.f32 %v1583_v48, %v1604_v55  ;;  %v1643_v1 = vmul.f32 %v1586_v49, %v1604_v55  ;;  %v1647_v2 = vmul.f32 %v1590_v50, %v1604_v55 }
  0xd5   : > { %vm385_vm4 = vcmp.ge.f32.partialorder %v1631_v62, %v1518_v29  ;;  %vm404_vm5 = vcmp.lt.f32.partialorder %v1631_v62, %v1521_v30  ;;  %v1269_v3 = vsel %vm411_vm3, 1.0, %v1401_v4  ;;  %v474_v5 = vmul.f32 %v1527_v32, %v1631_v62 }
  0xd6   : > { %2450 = vst [vmem:[#allocation9_spill] sm:$0xff] %v1643_v1  ;;  %v1656_v6 = vpop.f32.mrf.mxu0  ;;  %vm412_vm6 = vmand %vm385_vm4, %vm404_vm5  ;;  %v492_v10 = vadd.f32 %v1538_v35, %v473_v60  ;;  %v1663_v12 = vmul.f32 %v1547_v38, %v1631_v62  ;;  %v1667_v13 = vmul.f32 %v1567_v44, %v1631_v62 }
  0xd7   : > { %v1270_v15 = vsel %vm412_vm6, 1.0, %v1401_v4  ;;  %v493_v17 = vadd.f32 %v1558_v41, %v474_v5  ;;  %vm386_vm7 = vcmp.ge.f32.partialorder %v1656_v6, %v1506_v25  ;;  %vm405_vm8 = vcmp.lt.f32.partialorder %v1656_v6, %v1509_v26 }
  0xd8   : > { %2451 = vst [vmem:[#allocation10_spill] sm:$0xff] %v1667_v13  ;;  %v1675_v18 = vpop.f32.mrf.mxu0  ;;  %v1677_v19 = vmul.f32 %v1269_v3, %v492_v10  ;;  %v1357_v21 = vpack.i.bf16 %v1270_v15, %v1269_v3  ;;  %vm413_vm9 = vmand %vm386_vm7, %vm405_vm8  ;;  %v475_v23 = vmul.f32 %v1524_v31, %v1656_v6  ;;  %v1696_v39 = vmul.f32 %v1541_v36, %v1656_v6 }
  0xd9   : > { %v1683_v24 = vmul.f32 %v1270_v15, %v493_v17  ;;  %vm387_vm10 = vcmp.ge.f32.partialorder %v1675_v18, %v1518_v29  ;;  %vm406_vm11 = vcmp.lt.f32.partialorder %v1675_v18, %v1521_v30  ;;  %v1271_v27 = vsel %vm413_vm9, 1.0, %v1401_v4 }
  0xda   : > { %1358 = vrot.lane.b32.xlu0 %v1357_v21, %s1402_s16  ;;  %v1691_v28 = vpop.f32.mrf.mxu0  ;;  %vm414_vm12 = vmand %vm387_vm10, %vm406_vm11  ;;  %v494_v33 = vadd.f32 %v1538_v35, %v475_v23  ;;  %v476_v60 = vmul.f32 %v1527_v32, %v1675_v18  ;;  %v1702_v3 = vmul.f32 %v1547_v38, %v1675_v18  ;;  %v1885_v13 = vmul.f32 %v1602_v54, %v1675_v18 }
  0xdb   : > { %v1272_v5 = vsel %vm414_vm12, 1.0, %v1401_v4  ;;  %vm388_vm13 = vcmp.ge.f32.partialorder %v1691_v28, %v1506_v25  ;;  %vm407_vm14 = vcmp.lt.f32.partialorder %v1691_v28, %v1509_v26  ;;  %v477_v10 = vmul.f32 %v1524_v31, %v1691_v28 }
  0xdc   : > { %v1711_v15 = vpop.f32.mrf.mxu0  ;;  %v1362_v17 = vpack.i.bf16 %v1272_v5, %v1271_v27  ;;  %vm415_vm15 = vmand %vm388_vm13, %vm407_vm14  ;;  %v1713_v21 = vmul.f32 %v1271_v27, %v494_v33  ;;  %v495_v22 = vadd.f32 %v1558_v41, %v476_v60  ;;  %v1735_v9 = vmul.f32 %v1541_v36, %v1691_v28  ;;  %2460 = vst [vmem:[#allocation19_spill] sm:$0xff] %v1885_v13 }
  0xdd   : > { %vm389_vm1 = vcmp.ge.f32.partialorder %v1711_v15, %v1518_v29  ;;  %vm408_vm2 = vcmp.lt.f32.partialorder %v1711_v15, %v1521_v30  ;;  %v1273_v11 = vsel %vm415_vm15, 1.0, %v1401_v4  ;;  %v478_v14 = vmul.f32 %v1527_v32, %v1711_v15 }
  0xde   : > { %1363 = vrot.lane.b32.xlu0 %v1362_v17, %s1402_s16  ;;  %v1726_v27 = vpop.f32.mrf.mxu0  ;;  %vm416_vm3 = vmand %vm389_vm1, %vm408_vm2  ;;  %v496_v33 = vadd.f32 %v1538_v35, %v477_v10  ;;  %v1729_v23 = vmul.f32 %v1272_v5, %v495_v22  ;;  %v1751_v60 = vmul.f32 %v1547_v38, %v1711_v15  ;;  %v601_v17 = vmul.f32 %v1583_v48, %v1691_v28 }
  0xdf   : > { %v1274_v8 = vsel %vm416_vm3, 1.0, %v1401_v4  ;;  %v497_v7 = vadd.f32 %v1558_v41, %v478_v14  ;;  %vm390_vm4 = vcmp.ge.f32.partialorder %v1726_v27, %v1506_v25  ;;  %vm409_vm5 = vcmp.lt.f32.partialorder %v1726_v27, %v1509_v26 }
  0xe0   : > { %v1743_v10 = vpop.f32.mrf.mxu0  ;;  %v1745_v22 = vmul.f32 %v1273_v11, %v496_v33  ;;  %v1367_v5 = vpack.i.bf16 %v1274_v8, %v1273_v11  ;;  %vm417_vm6 = vmand %vm390_vm4, %vm409_vm5  ;;  %v1761_v25 = vrot.slane %v1555_v40, %v1491_v20  ;;  %v1794_v11 = vadd.f32 %v1596_v52, %v1639_v0 }
  0xe1   : > { %v1753_v14 = vmul.f32 %v1274_v8, %v497_v7  ;;  %vm391_vm7 = vcmp.ge.f32.partialorder %v1743_v10, %v1518_v29  ;;  %vm410_vm8 = vcmp.lt.f32.partialorder %v1743_v10, %v1521_v30  ;;  %v479_v7 = vmul.f32 %v1524_v31, %v1726_v27 }
  0xe2   : > { %2452 = vst [vmem:[#allocation11_spill] sm:$0xff] %v1761_v25  ;;  %1368 = vrot.lane.b32.xlu1 %v1367_v5, %s1402_s16  ;;  %vm418_vm9 = vmand %vm391_vm7, %vm410_vm8  ;;  %v1770_v8 = vmul.f32 %v1541_v36, %v1726_v27  ;;  %v480_v29 = vmul.f32 %v1527_v32, %v1743_v10  ;;  %v1275_v30 = vsel %vm417_vm6, 1.0, %v1401_v4  ;;  %v1786_v32 = vmul.f32 %v1564_v43, %v1656_v6  ;;  %v1265_v36 = vld [vmem:[%s2404_s2 + $0x16] ss:$8 sm:$0x3] }
  0xe3   : > { %v1276_v40 = vsel %vm418_vm9, 1.0, %v1401_v4  ;;  %v498_v31 = vadd.f32 %v1538_v35, %v479_v7  ;;  %v1790_v4 = vmul.f32 %v1567_v44, %v1675_v18  ;;  %v1798_v35 = vrot.slane %v1535_v34, %v1491_v20  ;;  %v1268_v34 = vld [vmem:[%s2404_s2 + $0x21] ss:$8 sm:$0x3] }
  0xe4   : > { %v1372_v5 = vpack.i.bf16 %v1276_v40, %v1275_v30  ;;  %v499_v26 = vadd.f32 %v1558_v41, %v480_v29  ;;  %2453 = vst [vmem:[#allocation12_spill] sm:$0xff] %v1786_v32  ;;  %v598_v29 = vmul.f32 %v1599_v53, %v1631_v62  ;;  %v1809_v33 = vmul.f32 %v1564_v43, %v1691_v28 }
  0xe5   : > { %2454 = vst [vmem:[#allocation13_spill] sm:$0xff] %v1790_v4  ;;  %v1801_v7 = vmul.f32 %v1275_v30, %v498_v31  ;;  %v600_v31 = vmul.f32 %v1599_v53, %v1675_v18  ;;  %v1830_v0 = vmul.f32 %v1564_v43, %v1726_v27  ;;  %v1847_v43 = vrot.slane %v1572_v45, %v1491_v20 }
  0xe6   : > { %1373 = vrot.lane.b32.xlu1 %v1372_v5, %s1402_s16  ;;  %v1803_v41 = vmul.f32 %v1276_v40, %v499_v26  ;;  %2455 = vst [vmem:[#allocation14_spill] sm:$0xff] %v1809_v33  ;;  %v1817_v5 = vmul.f32 %v1567_v44, %v1711_v15  ;;  %v599_v26 = vmul.f32 %v1583_v48, %v1656_v6 }
  0xe7   : > { %v1822_v30 = vadd.f32 %v1607_v56, %v598_v29  ;;  %2457 = vst [vmem:[#allocation16_spill] sm:$0xff] %v1830_v0  ;;  %v1850_v33 = vadd.f32 %v1607_v56, %v600_v31  ;;  %v602_v4 = vmul.f32 %v1599_v53, %v1711_v15  ;;  %v1859_v29 = vadd.f32 %v1596_v52, %v601_v17 }
  0xe8   : > { %2456 = vst [vmem:[#allocation15_spill] sm:$0xff] %v1817_v5  ;;  %v1841_v40 = vadd.f32 %v1596_v52, %v599_v26  ;;  %v603_v26 = vmul.f32 %v1583_v48, %v1726_v27  ;;  %v1863_v5 = vmul.f32 %v1602_v54, %v1631_v62  ;;  %v1866_v45 = vrot.slane %v1268_v34, %v1480_v16 }
  0xe9   : > { %v838_v31 = vrot.slane %v1265_v36, %v1480_v16  ;;  %v1870_v44 = vadd.f32 %v1607_v56, %v602_v4  ;;  %v1879_v17 = vmul.f32 %v1586_v49, %v1656_v6  ;;  %v1889_v4 = vadd.f32 %v1615_v58, %v1647_v2 }
  0xea   : > { %2458 = vst [vmem:[#allocation17_spill] sm:$0xff] %v1863_v5  ;;  %v1873_v0 = vadd.f32 %v1596_v52, %v603_v26  ;;  %v1893_v52 = vrot.slane %v1577_v46, %v1491_v20  ;;  %v722_v48 = vmul.f32 %v1798_v35, %v1631_v62  ;;  %v1901_v32 = vmul.f32 %v1586_v49, %v1691_v28 }
  0xeb   : > { %2459 = vst [vmem:[#allocation18_spill] sm:$0xff] %v1879_v17  ;;  %2461 = vst [vmem:[#allocation20_spill] sm:$0xff] %v1889_v4  ;;  %v1905_v5 = vmul.f32 %v1602_v54, %v1711_v15  ;;  %v723_v46 = vmul.f32 %v1590_v50, %v1656_v6  ;;  %v724_v26 = vmul.f32 %v1798_v35, %v1675_v18  ;;  %v1266_v54 = vld [vmem:[%s2404_s2 + $0x17] ss:$8 sm:$0x3] }
  0xec   : > { %2462 = vst [vmem:[#allocation21_spill] sm:$0xff] %v1893_v52  ;;  %2463 = vst [vmem:[#allocation22_spill] sm:$0xff] %v1901_v32  ;;  %v1915_v17 = vmul.f32 %v1586_v49, %v1726_v27  ;;  %v1918_v1 = vadd.f32 %v1847_v43, %v722_v48  ;;  %v1925_v2 = vrot.slane %v1265_v36, %v1491_v20 }
  0xed   : > { %2464 = vst [vmem:[#allocation23_spill] sm:$0xff] %v1905_v5  ;;  %v1928_v13 = vadd.f32 %v1615_v58, %v723_v46  ;;  %v1931_v51 = vadd.f32 %v1847_v43, %v724_v26  ;;  %v725_v48 = vmul.f32 %v1590_v50, %v1691_v28  ;;  %v726_v36 = vmul.f32 %v1798_v35, %v1711_v15 }
  0xee   : > { %2465 = vst [vmem:[#allocation24_spill] sm:$0xff] %v1915_v17  ;;  %v727_v46 = vmul.f32 %v1590_v50, %v1726_v27  ;;  %v1945_v4 = vrot.slane %v1268_v34, %v1491_v20  ;;  %v1948_v26 = vrot.slane %v1266_v54, %v1491_v20  ;;  %v1955_v17 = vmul.f32 %v1619_v59, %v1604_v55 }
  0xef   : > { %v1951_v49 = vadd.f32 %v1615_v58, %v725_v48  ;;  %v1959_v5 = vmul.f32 %v1619_v59, %v1656_v6  ;;  %v1963_v50 = vmul.f32 %v1893_v52, %v1675_v18  ;;  %v1966_v34 = vadd.f32 %v1847_v43, %v726_v36 }
  0xf0   : > { %v1969_v20 = vadd.f32 %v1615_v58, %v727_v46  ;;  %v846_v48 = vmul.f32 %v1925_v2, %v1631_v62  ;;  %v857_v32 = vrot.slane %v1266_v54, %v1480_v16  ;;  %v1982_v36 = vmul.f32 %v1893_v52, %v1631_v62 }
  0xf1   : > { %2466 = vst [vmem:[#allocation25_spill] sm:$0xff] %v1951_v49  ;;  %2467 = vst [vmem:[#allocation26_spill] sm:$0xff] %v1959_v5  ;;  %v845_v46 = vmul.f32 %v838_v31, %v1604_v55  ;;  %v1990_v16 = vmul.f32 %v1619_v59, %v1691_v28  ;;  %v1994_v54 = vmul.f32 %v1893_v52, %v1711_v15 }
  0xf2   : > { %2468 = vst [vmem:[#allocation27_spill] sm:$0xff] %v1963_v50  ;;  %2469 = vst [vmem:[#allocation28_spill] sm:$0xff] %v1982_v36  ;;  %v1985_v58 = vadd.f32 %v1948_v26, %v846_v48  ;;  %v848_v62 = vmul.f32 %v1925_v2, %v1675_v18  ;;  %v847_v57 = vmul.f32 %v838_v31, %v1656_v6 }
  0xf3   : > { %2470 = vst [vmem:[#allocation29_spill] sm:$0xff] %v1990_v16  ;;  %2471 = vst [vmem:[#allocation30_spill] sm:$0xff] %v1994_v54  ;;  %v2003_v48 = vmul.f32 %v1619_v59, %v1726_v27  ;;  %v2005_v55 = vadd.f32 %v857_v32, %v845_v46  ;;  %v850_v59 = vmul.f32 %v1925_v2, %v1711_v15 }
  0xf4   : > { %v2012_v50 = vadd.f32 %v1948_v26, %v848_v62  ;;  %v2014_v49 = vadd.f32 %v857_v32, %v847_v57  ;;  %v849_v18 = vmul.f32 %v838_v31, %v1691_v28  ;;  %v851_v46 = vmul.f32 %v838_v31, %v1726_v27 }
  0xf5   : > { %2472 = vst [vmem:[#allocation31_spill] sm:$0xff] %v2003_v48  ;;  %v2023_v25 = vadd.f32 %v1948_v26, %v850_v59  ;;  %v2473_v62 = vlaneseq  ;;  %v2474_v31 = vsub.f32 %v1544_v37, %v1629_v61  ;;  %v2475_v59 = vsub.f32 %v1561_v42, %v1663_v12 }
  0xf6   : > { %v2025_v16 = vadd.f32 %v857_v32, %v849_v18  ;;  %v2027_v52 = vadd.f32 %v857_v32, %v851_v46  ;;  %v2476_v12 = vsub.f32 %v1544_v37, %v1696_v39 }
  0xf7   : > { %v2030_v57 = vand.u32 127, %v2473_v62 }
  0xf9   : > { %vm453_vm10 = vcmp.lt.s32.totalorder %v2030_v57, 112 }
 0x14c   : > { %v1359_v6 = vpop.permute.xlu0 %1358 }
 0x14d   : > { %v1361_v48 = vunpack.i.h.bf16 %v1359_v6  ;;  %v1360_v54 = vunpack.i.l.bf16 %v1359_v6 }
 0x14f   : > { %v454_v28 = vsel %vm453_vm10, %v1360_v54, %v1361_v48  ;;  %v458_v15 = vsel %vm453_vm10, %v1361_v48, %v1360_v54 }
 0x150   : > { %v1364_v27 = vpop.permute.xlu0 %1363  ;;  %v546_v32 = vmul.f32 %v2474_v31, %v454_v28  ;;  %v547_v18 = vmul.f32 %v2475_v59, %v458_v15 }
 0x151   : > { %v1366_v46 = vunpack.i.h.bf16 %v1364_v27  ;;  %v1365_v62 = vunpack.i.l.bf16 %v1364_v27 }
 0x152   : > { %v554_v5 = vadd.f32 %v546_v32, %v1677_v19  ;;  %v555_v6 = vadd.f32 %v547_v18, %v1683_v24  ;;  %v2477_v19 = vsub.f32 %v1561_v42, %v1702_v3  ;;  %v526_v18 = vmul.f32 %v1547_v38, %v1743_v10 }
 0x153   : > { %v455_v36 = vsel %vm453_vm10, %v1365_v62, %v1366_v46  ;;  %v459_v54 = vsel %vm453_vm10, %v1366_v46, %v1365_v62 }
 0x154   : > { %562 = vrot.lane.b32.xlu0 %v554_v5, %s1402_s16  ;;  %v1369_v61 = vpop.permute.xlu1 %1368  ;;  %570 = vrot.lane.b32.xlu1 %v555_v6, %s1402_s16  ;;  %v548_v48 = vmul.f32 %v2476_v12, %v455_v36  ;;  %v549_v28 = vmul.f32 %v2477_v19, %v459_v54  ;;  %v624_v24 = vmul.f32 %v1794_v11, %v554_v5 }
 0x155   : > { %v1371_v15 = vunpack.i.h.bf16 %v1369_v61  ;;  %v1370_v27 = vunpack.i.l.bf16 %v1369_v61  ;;  %v625_v31 = vmul.f32 %v1822_v30, %v555_v6  ;;  %v2478_v5 = vsub.f32 %v1544_v37, %v1735_v9 }
 0x156   : > { %v556_v32 = vadd.f32 %v548_v48, %v1713_v21  ;;  %v557_v59 = vadd.f32 %v549_v28, %v1729_v23  ;;  %v2479_v23 = vsub.f32 %v1561_v42, %v1751_v60  ;;  %v545_v61 = vsub.f32 %v1561_v42, %v526_v18 }
 0x157   : > { %v456_v39 = vsel %vm453_vm10, %v1370_v27, %v1371_v15  ;;  %v460_v3 = vsel %vm453_vm10, %v1371_v15, %v1370_v27  ;;  %v604_v9 = vmul.f32 %v1599_v53, %v1743_v10  ;;  %v2483_v27 = vld [vmem:[#allocation10_spill] sm:$0xff] }
 0x158   : > { %564 = vrot.lane.b32.xlu0 %v556_v32, %s1402_s16  ;;  %572 = vrot.lane.b32.xlu1 %v557_v59, %s1402_s16  ;;  %v1374_v11 = vpop.permute.xlu1 %1373  ;;  %v550_v21 = vmul.f32 %v2478_v5, %v456_v39  ;;  %v551_v30 = vmul.f32 %v2479_v23, %v460_v3  ;;  %v626_v38 = vmul.f32 %v1841_v40, %v556_v32 }
 0x159   : > { %v1376_v36 = vunpack.i.h.bf16 %v1374_v11  ;;  %v1375_v46 = vunpack.i.l.bf16 %v1374_v11  ;;  %v627_v62 = vmul.f32 %v1850_v33, %v557_v59  ;;  %v623_v19 = vadd.f32 %v1607_v56, %v604_v9  ;;  %v2482_v56 = vld [vmem:[#allocation6_spill] sm:$0xff] }
 0x15a   : > { %v558_v6 = vadd.f32 %v550_v21, %v1745_v22  ;;  %v559_v54 = vadd.f32 %v551_v30, %v1753_v14  ;;  %v2480_v22 = vsub.f32 %v1544_v37, %v1770_v8  ;;  %v2484_v32 = vsub.f32 %v2482_v56, %v2483_v27  ;;  %v2485_v21 = vld [vmem:[#allocation12_spill] sm:$0xff] }
 0x15b   : > { %v457_v12 = vsel %vm453_vm10, %v1375_v46, %v1376_v36  ;;  %v461_v60 = vsel %vm453_vm10, %v1376_v36, %v1375_v46  ;;  %v2486_v23 = vsub.f32 %v1580_v47, %v2485_v21  ;;  %v977_v21 = vld [vmem:[%s2406_s4 + $0x68] sm:$0xff] }
 0x15c   : > { %566 = vrot.lane.b32.xlu0 %v558_v6, %s1402_s16  ;;  %574 = vrot.lane.b32.xlu1 %v559_v54, %s1402_s16  ;;  %v552_v33 = vmul.f32 %v2480_v22, %v457_v12  ;;  %v553_v14 = vmul.f32 %v545_v61, %v461_v60  ;;  %v628_v42 = vmul.f32 %v1859_v29, %v558_v6  ;;  %v2490_v60 = vld [vmem:[#allocation5_spill] sm:$0xff] }
 0x15d   : > { %v629_v40 = vmul.f32 %v1870_v44, %v559_v54  ;;  %v650_v22 = vmul.f32 %v2490_v60, %v1743_v10  ;;  %v972_v60 = vld [vmem:[%s2406_s4 + $0x40] sm:$0xff] }
 0x15e   : > { %v560_v53 = vadd.f32 %v552_v33, %v1801_v7  ;;  %v561_v48 = vadd.f32 %v553_v14, %v1803_v41  ;;  %v2481_v7 = vsub.f32 %v1580_v47, %v1635_v63  ;;  %v2487_v63 = vld [vmem:[#allocation13_spill] sm:$0xff] }
 0x15f   : > { %v2488_v36 = vsub.f32 %v2482_v56, %v2487_v63 }
 0x160   : > { %568 = vrot.lane.b32.xlu0 %v560_v53, %s1402_s16  ;;  %576 = vrot.lane.b32.xlu1 %v561_v48, %s1402_s16  ;;  %v630_v28 = vmul.f32 %v1873_v0, %v560_v53  ;;  %v631_v15 = vmul.f32 %v623_v19, %v561_v48  ;;  %v2491_v53 = vld [vmem:[#allocation14_spill] sm:$0xff] }
 0x161   : > { %v2492_v48 = vsub.f32 %v1580_v47, %v2491_v53  ;;  %v970_v53 = vld [vmem:[%s2406_s4 + $0x30] sm:$0xff] }
 0x1c6   : > { %v563_v37 = vpop.permute.xlu0 %562  ;;  %v571_v8 = vpop.permute.xlu1 %570 }
 0x1c7   : > { %v578_v29 = vsel %vm453_vm10, %v563_v37, %v571_v8  ;;  %v582_v44 = vsel %vm453_vm10, %v571_v8, %v563_v37 }
 0x1c8   : > { %v670_v41 = vmul.f32 %v2481_v7, %v578_v29  ;;  %v671_v59 = vmul.f32 %v2484_v32, %v582_v44  ;;  %v979_v29 = vld [vmem:[%s2406_s4 + $0x78] sm:$0xff]  ;;  %v994_v7 = vld [vmem:[%s2406_s4 + $0xf0] sm:$0xff] }
 0x1ca   : > { %v565_v18 = vpop.permute.xlu0 %564  ;;  %v573_v39 = vpop.permute.xlu1 %572  ;;  %v678_v0 = vadd.f32 %v670_v41, %v624_v24  ;;  %v679_v3 = vadd.f32 %v671_v59, %v625_v31  ;;  %v2489_v24 = vld [vmem:[#allocation20_spill] sm:$0xff] }
 0x1cb   : > { %v579_v11 = vsel %vm453_vm10, %v565_v18, %v573_v39  ;;  %v583_v5 = vsel %vm453_vm10, %v573_v39, %v565_v18  ;;  %v728_v18 = vmul.f32 %v1798_v35, %v1743_v10 }
 0x1cc   : > { %v672_v30 = vmul.f32 %v2486_v23, %v579_v11  ;;  %v673_v46 = vmul.f32 %v2488_v36, %v583_v5  ;;  %686 = vrot.lane.b32.xlu0 %v678_v0, %s1402_s16  ;;  %694 = vrot.lane.b32.xlu1 %v679_v3, %s1402_s16  ;;  %v2122_v31 = vmul.f32 %v2489_v24, %v678_v0  ;;  %v2497_v11 = vld [vmem:[#allocation25_spill] sm:$0xff]  ;;  %v992_v36 = vld [vmem:[%s2406_s4 + $0xe0] sm:$0xff]  ;;  %v963_v24 = vld [vmem:[%s2405_s3 + $0x8] sm:$0xff] }
 0x1cd   : > { %v2125_v6 = vmul.f32 %v1918_v1, %v679_v3  ;;  %v2493_v1 = vld [vmem:[#allocation15_spill] sm:$0xff]  ;;  %1337 = vmatprep.subr.mxu0 %v963_v24 }
 0x1ce   : > { %v567_v54 = vpop.permute.xlu0 %566  ;;  %v575_v61 = vpop.permute.xlu1 %574  ;;  %v680_v9 = vadd.f32 %v672_v30, %v626_v38  ;;  %v681_v12 = vadd.f32 %v673_v46, %v627_v62  ;;  %v2494_v37 = vsub.f32 %v2482_v56, %v2493_v1  ;;  %v995_v62 = vld [vmem:[%s2406_s4 + $0xf8] sm:$0xff]  ;;  %v976_v46 = vld [vmem:[%s2406_s4 + $0x60] sm:$0xff]  ;;  %1338 = vmatpush3.msra.mxu0 %v963_v24 }
 0x1cf   : > { %v580_v33 = vsel %vm453_vm10, %v567_v54, %v575_v61  ;;  %v584_v14 = vsel %vm453_vm10, %v575_v61, %v567_v54  ;;  %1287 = vmatprep.subr.mxu1 %v995_v62  ;;  %v974_v54 = vld [vmem:[%s2406_s4 + $0x50] sm:$0xff]  ;;  %v989_v61 = vld [vmem:[%s2406_s4 + $0xc8] sm:$0xff]  ;;  %v984_v1 = vld [vmem:[%s2406_s4 + $0xa0] sm:$0xff] }
 0x1d0   : > { %v674_v19 = vmul.f32 %v2492_v48, %v580_v33  ;;  %v675_v8 = vmul.f32 %v2494_v37, %v584_v14  ;;  %688 = vrot.lane.b32.xlu0 %v680_v9, %s1402_s16  ;;  %696 = vrot.lane.b32.xlu1 %v681_v12, %s1402_s16  ;;  %v2142_v38 = vmul.f32 %v1928_v13, %v680_v9  ;;  %v973_v9 = vld [vmem:[%s2406_s4 + $0x48] sm:$0xff]  ;;  %v971_v33 = vld [vmem:[%s2406_s4 + $0x38] sm:$0xff] }
 0x1d1   : > { %v2151_v44 = vmul.f32 %v1931_v51, %v681_v12  ;;  %v669_v13 = vsub.f32 %v2482_v56, %v650_v22  ;;  %1288 = vmatpush3.msra.mxu1 %v979_v29  ;;  %v978_v51 = vld [vmem:[%s2406_s4 + $0x70] sm:$0xff]  ;;  %v988_v12 = vld [vmem:[%s2406_s4 + $0xc0] sm:$0xff]  ;;  %v987_v22 = vld [vmem:[%s2406_s4 + $0xb8] sm:$0xff] }
 0x1d2   : > { %v569_v41 = vpop.permute.xlu0 %568  ;;  %v577_v27 = vpop.permute.xlu1 %576  ;;  %v682_v32 = vadd.f32 %v674_v19, %v628_v42  ;;  %v683_v59 = vadd.f32 %v675_v8, %v629_v40  ;;  %1289 = vmatprep.subr.mxu1 %v994_v7  ;;  %v993_v42 = vld [vmem:[%s2406_s4 + $0xe8] sm:$0xff]  ;;  %v2495_v40 = vld [vmem:[#allocation16_spill] sm:$0xff]  ;;  %v968_v37 = vld [vmem:[%s2406_s4 + $0x20] sm:$0xff] }
 0x1d3   : > { %v581_v39 = vsel %vm453_vm10, %v569_v41, %v577_v27  ;;  %v585_v0 = vsel %vm453_vm10, %v577_v27, %v569_v41  ;;  %v2496_v56 = vsub.f32 %v1580_v47, %v2495_v40  ;;  %1290 = vmatpush3.msra.mxu1 %v978_v51  ;;  %v747_v47 = vadd.f32 %v1847_v43, %v728_v18  ;;  %v991_v43 = vld [vmem:[%s2406_s4 + $0xd8] sm:$0xff]  ;;  %v986_v14 = vld [vmem:[%s2406_s4 + $0xb0] sm:$0xff]  ;;  %v985_v48 = vld [vmem:[%s2406_s4 + $0xa8] sm:$0xff] }
 0x1d4   : > { %v677_v3 = vmul.f32 %v669_v13, %v585_v0  ;;  %690 = vrot.lane.b32.xlu0 %v682_v32, %s1402_s16  ;;  %698 = vrot.lane.b32.xlu1 %v683_v59, %s1402_s16  ;;  %v2175_v5 = vmul.f32 %v2497_v11, %v682_v32  ;;  %v2181_v23 = vmul.f32 %v1966_v34, %v683_v59  ;;  %v969_v19 = vld [vmem:[%s2406_s4 + $0x28] sm:$0xff]  ;;  %v983_v8 = vld [vmem:[%s2406_s4 + $0x98] sm:$0xff]  ;;  %v2498_v29 = vld [vmem:[#allocation2_spill] sm:$0xff] }
 0x1d5   : > { %v676_v35 = vmul.f32 %v2496_v56, %v581_v39  ;;  %1291 = vmatprep.subr.mxu1 %v993_v42  ;;  %v967_v62 = vld [vmem:[%s2406_s4 + $0x18] sm:$0xff]  ;;  %v1278_v7 = vmul.f32 -1.442695, %v2498_v29  ;;  %v2499_v41 = vld [vmem:[#allocation3_spill] sm:$0xff]  ;;  %v2500_v27 = vld [vmem:[#allocation4_spill] sm:$0xff] }
 0x1d6   : > { %v685_v63 = vadd.f32 %v677_v3, %v631_v15  ;;  %1292 = vmatpush3.msra.mxu1 %v977_v21  ;;  %v975_v15 = vld [vmem:[%s2406_s4 + $0x58] sm:$0xff]  ;;  %v1279_v13 = vmul.f32 -1.442695, %v2499_v41  ;;  %v1280_v32 = vmul.f32 -1.442695, %v2500_v27  ;;  %v982_v40 = vld [vmem:[%s2406_s4 + $0x90] sm:$0xff] }
 0x1d7   : > { %v684_v30 = vadd.f32 %v676_v35, %v630_v28  ;;  %1293 = vmatprep.subr.mxu1 %v992_v36  ;;  %1381 = vpow2.f32 %v1278_v7  ;;  %v966_v56 = vld [vmem:[%s2406_s4 + $0x10] sm:$0xff]  ;;  %v981_v35 = vld [vmem:[%s2406_s4 + $0x88] sm:$0xff]  ;;  %v2507_v7 = vld [vmem:[#allocation18_spill] sm:$0xff] }
 0x1d8   : > { %700 = vrot.lane.b32.xlu1 %v685_v63, %s1402_s16  ;;  %v2195_v28 = vmul.f32 %v747_v47, %v685_v63  ;;  %1294 = vmatpush3.msra.mxu1 %v976_v46  ;;  %1383 = vpow2.f32 %v1279_v13  ;;  %v965_v11 = vld [vmem:[%s2406_s4 + $0x8] sm:$0xff]  ;;  %v980_v63 = vld [vmem:[%s2406_s4 + $0x80] sm:$0xff] }
 0x1d9   : > { %692 = vrot.lane.b32.xlu0 %v684_v30, %s1402_s16  ;;  %v2193_v34 = vmul.f32 %v1969_v20, %v684_v30  ;;  %v990_v20 = vld [vmem:[%s2406_s4 + $0xd0] sm:$0xff]  ;;  %1295 = vmatprep.subr.mxu1 %v991_v43  ;;  %1385 = vpow2.f32 %v1280_v32  ;;  %v964_v47 = vld [vmem:[%s2406_s4] sm:$0xff] }
 0x1da   : > { %1296 = vmatpush3.msra.mxu1 %v975_v15  ;;  %v962_v46 = vld [vmem:[%s2405_s3] sm:$0xff] }
 0x1db   : > { %1297 = vmatprep.subr.mxu1 %v990_v20  ;;  %1339 = vmatprep.subr.mxu0 %v962_v46 }
 0x1dc   : > { %1298 = vmatpush3.msra.mxu1 %v974_v54  ;;  %1340 = vmatpush3.msra.mxu0 %v962_v46 }
 0x1dd   : > { %1299 = vmatprep.subr.mxu1 %v989_v61  ;;  %v2501_v61 = vld [vmem:[#allocation8_spill] sm:$0xff] }
 0x1de   : > { %1300 = vmatpush3.msra.mxu1 %v973_v9  ;;  %v2502_v9 = vld [vmem:[#allocation9_spill] sm:$0xff] }
 0x1df   : > { %1301 = vmatprep.subr.mxu1 %v988_v12  ;;  %v2503_v12 = vsub.f32 %v2501_v61, %v2502_v9 }
 0x1e0   : > { %1302 = vmatpush3.msra.mxu1 %v972_v60 }
 0x1e1   : > { %1303 = vmatprep.subr.mxu1 %v987_v22  ;;  %v2504_v22 = vld [vmem:[#allocation11_spill] sm:$0xff] }
 0x1e2   : > { %1304 = vmatpush3.msra.mxu1 %v971_v33  ;;  %v2505_v33 = vld [vmem:[#allocation17_spill] sm:$0xff] }
 0x1e3   : > { %1305 = vmatprep.subr.mxu1 %v986_v14  ;;  %v2506_v14 = vsub.f32 %v2504_v22, %v2505_v33 }
 0x1e4   : > { %1306 = vmatpush3.msra.mxu1 %v970_v53  ;;  %v1382_v59 = vpop.eup %1381 }
 0x1e5   : > { %1307 = vmatprep.subr.mxu1 %v985_v48  ;;  %v1384_v18 = vpop.eup %1383  ;;  %v947_v51 = vadd.f32 1.0, %v1382_v59 }
 0x1e6   : > { %1308 = vmatpush3.msra.mxu1 %v969_v19  ;;  %v948_v39 = vadd.f32 1.0, %v1384_v18  ;;  %v1386_v0 = vpop.eup %1385 }
 0x1e7   : > { %1309 = vmatprep.subr.mxu1 %v984_v1  ;;  %1387 = vrcp.f32 %v947_v51  ;;  %v949_v42 = vadd.f32 1.0, %v1386_v0 }
 0x1e8   : > { %1310 = vmatpush3.msra.mxu1 %v968_v37  ;;  %1389 = vrcp.f32 %v948_v39 }
 0x1e9   : > { %1311 = vmatprep.subr.mxu1 %v983_v8  ;;  %1391 = vrcp.f32 %v949_v42  ;;  %v2511_v42 = vld [vmem:[#allocation7_spill] sm:$0xff] }
 0x1ea   : > { %1312 = vmatpush3.msra.mxu1 %v967_v62 }
 0x1eb   : > { %1313 = vmatprep.subr.mxu1 %v982_v40  ;;  %v774_v40 = vmul.f32 %v2511_v42, %v1743_v10  ;;  %v2526_v42 = vld [vmem:[#allocation29_spill] sm:$0xff] }
 0x1ec   : > { %1314 = vmatpush3.msra.mxu1 %v966_v56 }
 0x1ed   : > { %1315 = vmatprep.subr.mxu1 %v981_v35 }
 0x1ee   : > { %1316 = vmatpush3.msra.mxu1 %v965_v11  ;;  %v2514_v11 = vld [vmem:[#allocation23_spill] sm:$0xff] }
 0x1ef   : > { %1317 = vmatprep.subr.mxu1 %v980_v63 }
 0x1f0   : > { %1318 = vmatpush3.msra.mxu1 %v964_v47  ;;  %v793_v47 = vsub.f32 %v2504_v22, %v774_v40  ;;  %v2527_v40 = vsub.f32 %v1866_v45, %v2526_v42 }
 0x1f4   : > { %v1388_v3 = vpop.eup %1387 }
 0x1f5   : > { %v1390_v21 = vpop.eup %1389  ;;  %v959_v30 = vmul.f32 %v1388_v3, %v2498_v29 }
 0x1f6   : > { %v960_v36 = vmul.f32 %v1390_v21, %v2499_v41  ;;  %v1392_v43 = vpop.eup %1391  ;;  %v2508_v41 = vsub.f32 %v2501_v61, %v2507_v7  ;;  %v2515_v21 = vsub.f32 %v2504_v22, %v2514_v11 }
 0x1f7   : > { %1342 = vmatmul.mubr.msk.f32.vlgmr.msra.gmra.mxu0 %vm236_vm0, %v959_v30  ;;  %v961_v48 = vmul.f32 %v1392_v43, %v2500_v27  ;;  %v2509_v27 = vld [vmem:[#allocation19_spill] sm:$0xff] }
 0x1f8   : > { %1344 = vmatprep.mubr.msk.f32.mxu0 %vm236_vm0, %v960_v36  ;;  %v2510_v32 = vsub.f32 %v2504_v22, %v2509_v27 }
 0x1fb   : > { %1345 = vmatmul.mubr.msk.f32.gmra.mxu0 %vm236_vm0, %v961_v48  ;;  %vm1178_vm0 = vcmask 261120  }
 0x23e   : > { %v687_v15 = vpop.permute.xlu0 %686  ;;  %v695_v24 = vpop.permute.xlu1 %694 }
 0x23f   : > { %v702_v20 = vsel %vm453_vm10, %v687_v15, %v695_v24  ;;  %v706_v54 = vsel %vm453_vm10, %v695_v24, %v687_v15  ;;  %v852_v15 = vmul.f32 %v1925_v2, %v1743_v10 }
 0x240   : > { %v794_v60 = vmul.f32 %v2503_v12, %v702_v20  ;;  %v795_v53 = vmul.f32 %v2506_v14, %v706_v54 }
 0x242   : > { %v689_v19 = vpop.permute.xlu0 %688  ;;  %v697_v1 = vpop.permute.xlu1 %696  ;;  %v802_v37 = vadd.f32 %v794_v60, %v2122_v31  ;;  %v803_v8 = vadd.f32 %v795_v53, %v2125_v6  ;;  %v871_v60 = vadd.f32 %v1948_v26, %v852_v15  ;;  %v2519_v26 = vld [vmem:[#allocation28_spill] sm:$0xff] }
 0x243   : > { %v703_v62 = vsel %vm453_vm10, %v689_v19, %v697_v1  ;;  %v707_v29 = vsel %vm453_vm10, %v697_v1, %v689_v19  ;;  %v2520_v53 = vsub.f32 %v1945_v4, %v2519_v26 }
 0x244   : > { %v796_v13 = vmul.f32 %v2508_v41, %v703_v62  ;;  %v797_v59 = vmul.f32 %v2510_v32, %v707_v29  ;;  %810 = vrot.lane.b32.xlu0 %v802_v37, %s1402_s16  ;;  %818 = vrot.lane.b32.xlu1 %v803_v8, %s1402_s16  ;;  %v873_v31 = vmul.f32 %v1985_v58, %v803_v8  ;;  %v2512_v58 = vld [vmem:[#allocation22_spill] sm:$0xff] }
 0x245   : > { %v872_v6 = vmul.f32 %v2005_v55, %v802_v37  ;;  %v2513_v55 = vsub.f32 %v2501_v61, %v2512_v58  ;;  %v2521_v29 = vld [vmem:[#allocation26_spill] sm:$0xff] }
 0x246   : > { %v691_v18 = vpop.permute.xlu0 %690  ;;  %v699_v51 = vpop.permute.xlu1 %698  ;;  %v804_v39 = vadd.f32 %v796_v13, %v2142_v38  ;;  %v805_v0 = vadd.f32 %v797_v59, %v2151_v44  ;;  %v2522_v7 = vsub.f32 %v1866_v45, %v2521_v29 }
 0x247   : > { %v704_v56 = vsel %vm453_vm10, %v691_v18, %v699_v51  ;;  %v708_v35 = vsel %vm453_vm10, %v699_v51, %v691_v18  ;;  %v2525_v18 = vld [vmem:[#allocation21_spill] sm:$0xff] }
 0x248   : > { %v798_v3 = vmul.f32 %v2513_v55, %v704_v56  ;;  %v799_v30 = vmul.f32 %v2515_v21, %v708_v35  ;;  %812 = vrot.lane.b32.xlu0 %v804_v39, %s1402_s16  ;;  %820 = vrot.lane.b32.xlu1 %v805_v0, %s1402_s16  ;;  %v875_v38 = vmul.f32 %v2012_v50, %v805_v0  ;;  %v2516_v50 = vld [vmem:[#allocation24_spill] sm:$0xff]  ;;  %v2528_v35 = vld [vmem:[#allocation30_spill] sm:$0xff] }
 0x249   : > { %v874_v44 = vmul.f32 %v2014_v49, %v804_v39  ;;  %v2517_v49 = vsub.f32 %v2501_v61, %v2516_v50  ;;  %v898_v51 = vmul.f32 %v2525_v18, %v1743_v10  ;;  %v2529_v58 = vsub.f32 %v1945_v4, %v2528_v35 }
 0x24a   : > { %v701_v36 = vpop.permute.xlu1 %700  ;;  %v806_v46 = vadd.f32 %v798_v3, %v2175_v5  ;;  %v807_v43 = vadd.f32 %v799_v30, %v2181_v23 }
 0x24b   : > { %v693_v63 = vpop.permute.xlu0 %692  ;;  %v917_v11 = vsub.f32 %v1945_v4, %v898_v51 }
 0x24c   : > { %v705_v24 = vsel %vm453_vm10, %v693_v63, %v701_v36  ;;  %v709_v20 = vsel %vm453_vm10, %v701_v36, %v693_v63  ;;  %814 = vrot.lane.b32.xlu0 %v806_v46, %s1402_s16  ;;  %822 = vrot.lane.b32.xlu1 %v807_v43, %s1402_s16  ;;  %v877_v5 = vmul.f32 %v2023_v25, %v807_v43  ;;  %v2530_v63 = vld [vmem:[#allocation31_spill] sm:$0xff] }
 0x24d   : > { %v800_v54 = vmul.f32 %v2517_v49, %v705_v24  ;;  %v801_v9 = vmul.f32 %v793_v47, %v709_v20  ;;  %v876_v23 = vmul.f32 %v2025_v16, %v806_v46  ;;  %v2531_v47 = vsub.f32 %v1866_v45, %v2530_v63 }
 0x24f   : > { %v808_v2 = vadd.f32 %v800_v54, %v2193_v34  ;;  %v809_v12 = vadd.f32 %v801_v9, %v2195_v28  ;;  %v2518_v34 = vsub.f32 %v1866_v45, %v1955_v17  ;;  %v2523_v17 = vld [vmem:[#allocation27_spill] sm:$0xff] }
 0x250   : > { %v2524_v13 = vsub.f32 %v1945_v4, %v2523_v17 }
 0x251   : > { %816 = vrot.lane.b32.xlu0 %v808_v2, %s1402_s16  ;;  %824 = vrot.lane.b32.xlu1 %v809_v12, %s1402_s16  ;;  %v879_v61 = vmul.f32 %v871_v60, %v809_v12  ;;  %v878_v22 = vmul.f32 %v2027_v52, %v808_v2 }
 0x2b6   : > { %v811_v33 = vpop.permute.xlu0 %810  ;;  %v819_v14 = vpop.permute.xlu1 %818 }
 0x2b7   : > { %v826_v25 = vsel %vm453_vm10, %v811_v33, %v819_v14  ;;  %v830_v16 = vsel %vm453_vm10, %v819_v14, %v811_v33  ;;  %v1343_v4 = vpop.f32.mrf.mxu0 }
 0x2b8   : > { %v918_v28 = vmul.f32 %v2518_v34, %v826_v25  ;;  %v919_v48 = vmul.f32 %v2520_v53, %v830_v16 }
 0x2b9   : > { %v1159_v50 = vpop.f32.mrf.mxu0 }
 0x2ba   : > { %v813_v19 = vpop.permute.xlu0 %812  ;;  %v821_v1 = vpop.permute.xlu1 %820  ;;  %v927_v37 = vadd.f32 %v919_v48, %v873_v31  ;;  %v926_v52 = vadd.f32 %v918_v28, %v872_v6 }
 0x2bb   : > { %v827_v8 = vsel %vm453_vm10, %v813_v19, %v821_v1  ;;  %v831_v62 = vsel %vm453_vm10, %v821_v1, %v813_v19  ;;  %v1346_v9 = vpop.f32.mrf.mxu0 }
 0x2bc   : > { %v920_v41 = vmul.f32 %v2522_v7, %v827_v8  ;;  %v921_v27 = vmul.f32 %v2524_v13, %v831_v62  ;;  %1060 = vmatprep.mubr.f32.mxu1 %v927_v37 }
 0x2bd   : > { %1061 = vmatmul.mubr.f32.vlgmr.msra.gmra.mxu1 %v926_v52  ;;  %v1169_v60 = vpop.f32.mrf.mxu0 }
 0x2be   : > { %v815_v32 = vpop.permute.xlu0 %814  ;;  %v823_v59 = vpop.permute.xlu1 %822  ;;  %v929_v31 = vadd.f32 %v921_v27, %v875_v38  ;;  %v928_v6 = vadd.f32 %v920_v41, %v874_v44 }
 0x2bf   : > { %v828_v39 = vsel %vm453_vm10, %v815_v32, %v823_v59  ;;  %v832_v0 = vsel %vm453_vm10, %v823_v59, %v815_v32 }
 0x2c0   : > { %v922_v56 = vmul.f32 %v2527_v40, %v828_v39  ;;  %v923_v55 = vmul.f32 %v2529_v58, %v832_v0  ;;  %1065 = vmatprep.mubr.f32.mxu1 %v929_v31 }
 0x2c1   : > { %1066 = vmatmul.mubr.f32.gmra.mxu1 %v928_v6 }
 0x2c2   : > { %v931_v21 = vadd.f32 %v923_v55, %v877_v5  ;;  %v930_v30 = vadd.f32 %v922_v56, %v876_v23 }
 0x2c3   : > { %v817_v3 = vpop.permute.xlu0 %816  ;;  %v825_v10 = vpop.permute.xlu1 %824 }
 0x2c4   : > { %v829_v38 = vsel %vm453_vm10, %v817_v3, %v825_v10  ;;  %v833_v44 = vsel %vm453_vm10, %v825_v10, %v817_v3  ;;  %1070 = vmatprep.mubr.f32.mxu1 %v931_v21 }
 0x2c5   : > { %v924_v36 = vmul.f32 %v2531_v47, %v829_v38  ;;  %v925_v46 = vmul.f32 %v917_v11, %v833_v44  ;;  %1071 = vmatmul.mubr.f32.gmra.mxu1 %v930_v30 }
 0x2c7   : > { %v933_v43 = vadd.f32 %v925_v46, %v879_v61  ;;  %v932_v15 = vadd.f32 %v924_v36, %v878_v22 }
 0x2c9   : > { %1075 = vmatprep.mubr.f32.mxu1 %v933_v43 }
 0x2ca   : > { %1076 = vmatmul.mubr.f32.gmra.mxu1 %v932_v15 }
 0x37d   : > { %v1319_v24 = vpop.f32.mrf.mxu1 }
 0x37f   : > { %v1320_v20 = vpop.f32.mrf.mxu1 }
 0x380   : > { %v1321_v49 = vadd.f32 %v1320_v20, %v1319_v24 }
 0x381   : > { %v1322_v54 = vpop.f32.mrf.mxu1 }
 0x382   : > { %v1160_v45 = vadd.f32 %v1321_v49, %v1159_v50 }
 0x383   : > { %v1323_v57 = vpop.f32.mrf.mxu1 }
 0x384   : > { %1179 = vst.msk [vmem:[%s226_s7] sm:$0xff] %vm1178_vm0, %v1160_v45  ;;  %v1324_v5 = vadd.f32 %v1323_v57, %v1322_v54 }
 0x385   : > { %v1325_v23 = vpop.f32.mrf.mxu1 }
 0x386   : > { %v1165_v2 = vadd.f32 %v1343_v4, %v1324_v5 }
 0x387   : > { %v1326_v12 = vpop.f32.mrf.mxu1 }
 0x388   : > { %1180 = vst.msk [vmem:[%s226_s7 + $0x8] sm:$0xff] %vm1178_vm0, %v1165_v2  ;;  %v1327_v61 = vadd.f32 %v1326_v12, %v1325_v23 }
 0x38a   : > { %v1328_v22 = vpop.f32.mrf.mxu1  ;;  %v1170_v33 = vadd.f32 %v1327_v61, %v1169_v60 }
 0x38c   : > { %v1329_v14 = vpop.f32.mrf.mxu1  ;;  %1181 = vst.msk [vmem:[%s226_s7 + $0x10] sm:$0xff] %vm1178_vm0, %v1170_v33 }
 0x38d   : > { %v1330_v25 = vadd.f32 %v1329_v14, %v1328_v22 }
 0x38f   : > { %v1175_v16 = vadd.f32 %v1346_v9, %v1330_v25 }
 0x391   : > { %1182 = vst.msk [vmem:[%s226_s7 + $0x18] sm:$0xff] %vm1178_vm0, %v1175_v16 }
 0x392 PF: > { %s15_s18 = sadd.s32 1, %s1399_s18  }
 0x393   : > { %p12_p4 = scmp.ge.s32.totalorder %s15_s18, 4  }
 0x395   :  { %14 = sbr.rel (!%p12_p4) target bundleno = 1 (0x1), region = 87 }

</bundles_post_ra>
